<compile_context>
chip_gen: v5e
topology: v5e:2x2
jax: 0.10.0
libtpu: 0.0.40
codegen_flags: <defaults>
</compile_context>

<pallas_src>
import functools

import jax
import jax.numpy as jnp
from jax import lax
from jax.experimental import pallas as pl
from jax.experimental.pallas import tpu as pltpu

LANES = 128


def _round_up(x, m):
    return -(-x // m) * m


def _chip_config():
    """(max_block_rows, target_ncores) per TPU generation.

    Double-buffered input footprint = 3 operands x 2 bufs x block_rows x 128 x 4B:
      4096 rows -> 12 MiB (fits 16 MiB default scoped VMEM on v5e/v4)
      8192 rows -> 24 MiB (fits 32 MiB default scoped VMEM on v6e/v7x;
                           well under v7x's 64 MiB physical per-TC VMEM)
    """
    try:
        kind = jax.devices()[0].device_kind.lower()
    except Exception:
        kind = ""
    if "v7" in kind:
        return 8192, 2          # 2 TensorCores per chip: split the HBM stream
    if "v6" in kind:
        return 8192, 1
    return 4096, 1              # v5e / v5p / v4 / unknown: conservative


def _sublane_tile(dtypes):
    """Sublane tile rows: 8 for 32-bit, 16 for bf16/fp16, 32 for int8/fp8."""
    tile = 8
    for dt in dtypes:
        packing = max(1, 4 // jnp.dtype(dt).itemsize)
        tile = max(tile, 8 * packing)
    return tile


def _sse_kernel(*refs, has_fine, block_rows, total_rows, num_full_blocks,
                steps_per_core, needs_mask, scale):
    """Per-core partial of coef/n * sum((coarse-t)^2 [+ (fine-t)^2])."""
    if has_fine:
        c_ref, f_ref, t_ref, o_ref, acc_ref = refs
    else:
        c_ref, t_ref, o_ref, acc_ref = refs
        f_ref = None

    c = pl.program_id(0)
    s = pl.program_id(1)

    @pl.when(s == 0)
    def _init():
        acc_ref[...] = jnp.zeros_like(acc_ref)

    t = t_ref[...].astype(jnp.float32)
    d = c_ref[...].astype(jnp.float32) - t
    sq = d * d
    if has_fine:
        df = f_ref[...].astype(jnp.float32) - t
        sq = sq + df * df

    def fold(block):
        # (block_rows, 128) -> (block_rows//8, 8, 128), sum over the leading
        # (major) axis: plain VALU vreg adds into the single-vreg accumulator.
        return block.reshape(block_rows // 8, 8, LANES).sum(axis=0)

    if needs_mask:
        b = c * steps_per_core + s          # logical (unclamped) block index
        @pl.when(b < num_full_blocks)
        def _steady():
            acc_ref[...] += fold(sq)

        @pl.when(b >= num_full_blocks)      # ragged last block / phantom step
        def _tail():
            row = b * block_rows + lax.broadcasted_iota(jnp.int32, sq.shape, 0)
            # keep this a select (not multiply-by-mask): padded rows hold
            # unspecified data that must not be able to leak NaN/Inf.
            acc_ref[...] += fold(jnp.where(row < total_rows, sq, 0.0))
    else:
        acc_ref[...] += fold(sq)

    @pl.when(s == pl.num_programs(1) - 1)
    def _finish():
        # Single 8-sublane reduce per core; coef/numel scaling folded in.
        o_ref[0] = jnp.sum(acc_ref[...], axis=0, keepdims=True) * scale


def color_loss(inputs, targets, coef=1.0):
    """JAX/Pallas equivalent of ColorLoss.forward (nn.MSELoss reduction='mean').

    Note: `coef` must be a static Python scalar (it is folded into the kernel).
    """
    has_fine = 'rgb_fine' in inputs
    n_elems = int(targets.size)               # MSE 'mean' divides by total numel
    scale = float(coef) / float(n_elems)

    arrs = [inputs['rgb_coarse']] + ([inputs['rgb_fine']] if has_fine else []) \
           + [targets]
    flats = [a.reshape(-1) for a in arrs]     # free (row-major contiguous)
    main = (n_elems // LANES) * LANES         # lane-aligned prefix length

    loss = jnp.float32(0.0)

    if main:
        # Aligned case: the reshape is a free bitcast (no pad, no copy).
        operands = [(f if main == n_elems else f[:main]).reshape(-1, LANES)
                    for f in flats]

        total_rows = main // LANES
        max_rows, target_cores = _chip_config()
        tile = _sublane_tile([a.dtype for a in arrs])
        block_rows = min(max_rows, _round_up(total_rows, tile))
        num_row_blocks = pl.cdiv(total_rows, block_rows)
        ncores = target_cores if num_row_blocks >= target_cores else 1
        steps_per_core = pl.cdiv(num_row_blocks, ncores)
        phantom = steps_per_core * ncores != num_row_blocks
        num_full_blocks = total_rows // block_rows
        needs_mask = phantom or (total_rows % block_rows != 0)
        last_block = num_row_blocks - 1

        def in_map(c, s):
            b = c * steps_per_core + s
            if phantom:
                # Phantom steps re-read the last block; fully masked in-kernel.
                b = jnp.minimum(b, last_block)
            return (b, 0)

        kernel = functools.partial(
            _sse_kernel,
            has_fine=has_fine, block_rows=block_rows, total_rows=total_rows,
            num_full_blocks=num_full_blocks, steps_per_core=steps_per_core,
            needs_mask=needs_mask, scale=scale)

        in_spec = pl.BlockSpec((block_rows, LANES), in_map)
        flops = (6 if has_fine else 3) * main
        bytes_accessed = sum(int(op.size) * op.dtype.itemsize for op in operands) \
            + ncores * LANES * 4

        partials = pl.pallas_call(
            kernel,
            out_shape=jax.ShapeDtypeStruct((ncores, 1, LANES), jnp.float32),
            grid_spec=pltpu.PrefetchScalarGridSpec(
                num_scalar_prefetch=0,
                grid=(ncores, steps_per_core),
                in_specs=[in_spec] * len(operands),
                out_specs=pl.BlockSpec((1, 1, LANES), lambda c, s: (c, 0, 0)),
                scratch_shapes=[pltpu.VMEM((8, LANES), jnp.float32)]),
            compiler_params=pltpu.CompilerParams(
                dimension_semantics=("parallel", "arbitrary")),
            cost_estimate=pl.CostEstimate(flops=flops, transcendentals=0,
                                          bytes_accessed=bytes_accessed),
        )(*operands)

        # Tiny cross-core / cross-lane combine (scale & coef already applied).
        loss = loss + jnp.sum(partials)

    if main < n_elems:
        # Ragged lane tail (< 128 elements per operand): fold in with plain JAX
        # instead of padding/copying the whole operand through HBM.
        tails = [f[main:].astype(jnp.float32) for f in flats]
        t = tails[-1]
        sse = jnp.sum((tails[0] - t) ** 2)
        if has_fine:
            sse = sse + jnp.sum((tails[1] - t) ** 2)
        loss = loss + jnp.float32(scale) * sse

    return loss


if __name__ == "__main__":
    key = jax.random.PRNGKey(0)
    k1, k2, k3 = jax.random.split(key, 3)

    # --- main case: small NeRF-style batch of rays (numel multiple of 128) ---
    n_rays = 1024
    rgb_coarse = jax.random.uniform(k1, (n_rays, 3), dtype=jnp.float32)
    rgb_fine = jax.random.uniform(k2, (n_rays, 3), dtype=jnp.float32)
    targets = jax.random.uniform(k3, (n_rays, 3), dtype=jnp.float32)
    coef = 1.0

    loss = jax.block_until_ready(
        color_loss({'rgb_coarse': rgb_coarse, 'rgb_fine': rgb_fine}, targets,
                   coef=coef))
    ref = jnp.mean((rgb_coarse.reshape(-1, 3) - targets.reshape(-1, 3)) ** 2)
    ref = ref + jnp.mean((rgb_fine.reshape(-1, 3) - targets.reshape(-1, 3)) ** 2)
    ref = coef * ref
    assert jnp.allclose(loss, ref, rtol=1e-5, atol=1e-6), (loss, ref)

    # --- coarse-only path (no 'rgb_fine' key) ---
    loss_c = jax.block_until_ready(
        color_loss({'rgb_coarse': rgb_coarse}, targets, coef=coef))
    ref_c = coef * jnp.mean((rgb_coarse.reshape(-1, 3) - targets.reshape(-1, 3)) ** 2)
    assert jnp.allclose(loss_c, ref_c, rtol=1e-5, atol=1e-6), (loss_c, ref_c)

    # --- ragged case (numel % 128 != 0): exercises in-kernel row mask + JAX tail ---
    n_small = 100
    cs = jax.random.uniform(k1, (n_small, 3), dtype=jnp.float32)
    ts = jax.random.uniform(k3, (n_small, 3), dtype=jnp.float32)
    loss_s = jax.block_until_ready(color_loss({'rgb_coarse': cs}, ts, coef=2.0))
    ref_s = 2.0 * jnp.mean((cs.reshape(-1, 3) - ts.reshape(-1, 3)) ** 2)
    assert jnp.allclose(loss_s, ref_s, rtol=1e-5, atol=1e-6), (loss_s, ref_s)

    # --- bf16 inputs: exercises the 16-row sublane tile + in-VMEM f32 cast ---
    n_bf = 256
    cb = jax.random.uniform(k1, (n_bf, 3), dtype=jnp.float32).astype(jnp.bfloat16)
    fb = jax.random.uniform(k2, (n_bf, 3), dtype=jnp.float32).astype(jnp.bfloat16)
    tb = jax.random.uniform(k3, (n_bf, 3), dtype=jnp.float32).astype(jnp.bfloat16)
    loss_b = jax.block_until_ready(
        color_loss({'rgb_coarse': cb, 'rgb_fine': fb}, tb, coef=1.0))
    tb32 = tb.astype(jnp.float32)
    ref_b = jnp.mean((cb.astype(jnp.float32) - tb32) ** 2) \
        + jnp.mean((fb.astype(jnp.float32) - tb32) ** 2)
    assert jnp.allclose(loss_b, ref_b, rtol=1e-5, atol=1e-6), (loss_b, ref_b)

    print("KERNEL_OK")
</pallas_src>

<mosaic_0001>
module attributes {stable_mosaic.version = 11 : i64} {
  func.func @_sse_kernel(%arg0: i32, %arg1: i32, %arg2: memref<24x128xf32, #tpu.memory_space<vmem>>, %arg3: memref<24x128xf32, #tpu.memory_space<vmem>>, %arg4: memref<24x128xf32, #tpu.memory_space<vmem>>, %arg5: memref<1x1x128xf32, #tpu.memory_space<vmem>>, %arg6: memref<8x128xf32, #tpu.memory_space<vmem>>) attributes {dimension_semantics = [#tpu.dimension_semantics<parallel>, #tpu.dimension_semantics<arbitrary>], iteration_bounds = array<i64: 1, 1>, scalar_prefetch = 0 : i64, scratch_operands = 1 : i64, tpu.core_type = #tpu.core_type<tc>, window_params = [{transform_indices = @transform_0, window_bounds = array<i64: 24, 128>}, {transform_indices = @transform_1, window_bounds = array<i64: 24, 128>}, {transform_indices = @transform_2, window_bounds = array<i64: 24, 128>}, {transform_indices = @transform_3, window_bounds = array<i64: 1, 1, 128>}]} {
    %c0_i32 = arith.constant 0 : i32
    %0 = arith.cmpi eq, %arg1, %c0_i32 : i32
    %1 = arith.extui %0 : i1 to i32
    %c0_i32_0 = arith.constant 0 : i32
    %2 = arith.cmpi ne, %1, %c0_i32_0 : i32
    scf.if %2 {
      %cst_12 = arith.constant 0.000000e+00 : f32
      %19 = vector.broadcast %cst_12 : f32 to vector<8x128xf32>
      %c0_13 = arith.constant 0 : index
      %c0_14 = arith.constant 0 : index
      %20 = vector.load %arg6[%c0_13, %c0_14] : memref<8x128xf32, #tpu.memory_space<vmem>>, vector<8x128xf32>
      tpu.vector_store %arg6[%c0_13, %c0_14], %19 {strides = array<i32>} : memref<8x128xf32, #tpu.memory_space<vmem>>, vector<8x128xf32>,
    } else {
    }
    %c0 = arith.constant 0 : index
    %c0_1 = arith.constant 0 : index
    %3 = vector.load %arg4[%c0, %c0_1] : memref<24x128xf32, #tpu.memory_space<vmem>>, vector<24x128xf32>
    %c0_2 = arith.constant 0 : index
    %c0_3 = arith.constant 0 : index
    %4 = vector.load %arg2[%c0_2, %c0_3] : memref<24x128xf32, #tpu.memory_space<vmem>>, vector<24x128xf32>
    %5 = arith.subf %4, %3 : vector<24x128xf32>
    %6 = arith.mulf %5, %5 : vector<24x128xf32>
    %c0_4 = arith.constant 0 : index
    %c0_5 = arith.constant 0 : index
    %7 = vector.load %arg3[%c0_4, %c0_5] : memref<24x128xf32, #tpu.memory_space<vmem>>, vector<24x128xf32>
    %8 = arith.subf %7, %3 : vector<24x128xf32>
    %9 = arith.mulf %8, %8 : vector<24x128xf32>
    %10 = arith.addf %6, %9 : vector<24x128xf32>
    %c0_6 = arith.constant 0 : index
    %c0_7 = arith.constant 0 : index
    %11 = vector.load %arg6[%c0_6, %c0_7] : memref<8x128xf32, #tpu.memory_space<vmem>>, vector<8x128xf32>
    %12 = vector.shape_cast %10 : vector<24x128xf32> to vector<3x8x128xf32>
    %cst = arith.constant dense<0.000000e+00> : vector<8x128xf32>
    %13 = vector.multi_reduction <add>, %12, %cst [0] : vector<3x8x128xf32> to vector<8x128xf32>
    %14 = arith.addf %11, %13 : vector<8x128xf32>
    %c0_8 = arith.constant 0 : index
    %c0_9 = arith.constant 0 : index
    %15 = vector.load %arg6[%c0_8, %c0_9] : memref<8x128xf32, #tpu.memory_space<vmem>>, vector<8x128xf32>
    tpu.vector_store %arg6[%c0_8, %c0_9], %14 {strides = array<i32>} : memref<8x128xf32, #tpu.memory_space<vmem>>, vector<8x128xf32>,
    %c0_i32_10 = arith.constant 0 : i32
    %16 = arith.cmpi eq, %arg1, %c0_i32_10 : i32
    %17 = arith.extui %16 : i1 to i32
    %c0_i32_11 = arith.constant 0 : i32
    %18 = arith.cmpi ne, %17, %c0_i32_11 : i32
    scf.if %18 {
      %c0_12 = arith.constant 0 : index
      %c0_13 = arith.constant 0 : index
      %19 = vector.load %arg6[%c0_12, %c0_13] : memref<8x128xf32, #tpu.memory_space<vmem>>, vector<8x128xf32>
      %cst_14 = arith.constant dense<0.000000e+00> : vector<128xf32>
      %20 = vector.multi_reduction <add>, %19, %cst_14 [0] : vector<8x128xf32> to vector<128xf32>
      %21 = vector.shape_cast %20 : vector<128xf32> to vector<1x128xf32>
      %cst_15 = arith.constant 3.25520843E-4 : f32
      %22 = vector.broadcast %cst_15 : f32 to vector<1x128xf32>
      %23 = arith.mulf %21, %22 : vector<1x128xf32>
      %c0_16 = arith.constant 0 : index
      %c0_17 = arith.constant 0 : index
      %c0_18 = arith.constant 0 : index
      %24 = vector.load %arg5[%c0_16, %c0_17, %c0_18] : memref<1x1x128xf32, #tpu.memory_space<vmem>>, vector<1x1x128xf32>
      %25 = vector.shape_cast %24 : vector<1x1x128xf32> to vector<1x128xf32>
      %26 = vector.shape_cast %23 : vector<1x128xf32> to vector<1x1x128xf32>
      tpu.vector_store %arg5[%c0_16, %c0_17, %c0_18], %26 {strides = array<i32>} : memref<1x1x128xf32, #tpu.memory_space<vmem>>, vector<1x1x128xf32>,
    } else {
    }
    return
  }
  func.func @transform_0(%arg0: i32, %arg1: i32) -> (i32, i32) {
    %c1_i32 = arith.constant 1 : i32
    %0 = arith.muli %arg0, %c1_i32 : i32
    %1 = arith.addi %0, %arg1 : i32
    %c0_i32 = arith.constant 0 : i32
    %c0_i32_0 = arith.constant 0 : i32
    return %1, %c0_i32 : i32, i32
  }
  func.func @transform_1(%arg0: i32, %arg1: i32) -> (i32, i32) {
    %c1_i32 = arith.constant 1 : i32
    %0 = arith.muli %arg0, %c1_i32 : i32
    %1 = arith.addi %0, %arg1 : i32
    %c0_i32 = arith.constant 0 : i32
    %c0_i32_0 = arith.constant 0 : i32
    return %1, %c0_i32 : i32, i32
  }
  func.func @transform_2(%arg0: i32, %arg1: i32) -> (i32, i32) {
    %c1_i32 = arith.constant 1 : i32
    %0 = arith.muli %arg0, %c1_i32 : i32
    %1 = arith.addi %0, %arg1 : i32
    %c0_i32 = arith.constant 0 : i32
    %c0_i32_0 = arith.constant 0 : i32
    return %1, %c0_i32 : i32, i32
  }
  func.func @transform_3(%arg0: i32, %arg1: i32) -> (i32, i32, i32) {
    %c0_i32 = arith.constant 0 : i32
    %c0_i32_0 = arith.constant 0 : i32
    %c0_i32_1 = arith.constant 0 : i32
    return %arg0, %c0_i32, %c0_i32_0 : i32, i32, i32
  }
}

</mosaic_0001>

<bundles_post_ra>
// kernel: tpu_custom_call.1
= control target key start
LH: loop header
LB: loop body
LE: loop exit
PB: predicated region body
PF: predicated region fallthrough
CT: control target
= control target key end

     0   :  { %8 = vsyncpa [#allocation4], 0  ;;  %s290_s0 = inlined_call_operand.hbm [shape: f32[24,128], index: 0, kind: input, shape index: {}]   ;;  %s291_s1 = inlined_call_operand.hbm [shape: f32[24,128], index: 1, kind: input, shape index: {}]   ;;  %s292_s2 = inlined_call_operand.hbm [shape: f32[24,128], index: 2, kind: input, shape index: {}]   ;;  %s293_s3 = inlined_call_operand.hbm [shape: f32[1,1,128], index: 3, kind: output, shape index: {}]  }
   0x1   :  { %9 = vsyncpa [#allocation7], 0 }
   0x2   :  { %10 = vsyncpa [#allocation5], 0  ;;  %s36_s14 = sshll.u32 %s291_s1, 4  ;;  %s252_s15 = smov [#allocation6]   ;;  %s37_s14 = int_to_ptr.hbm [resolvable:$true] %s36_s14 }
   0x3   :  { %s38_s16 = sshll.u32 %s252_s15, 4  ;;  %s19_s19 = sshll.u32 %s290_s0, 4  ;;  %s39_s16 = int_to_ptr.vmem [resolvable:$true] %s38_s16  ;;  %s20_s19 = int_to_ptr.hbm [resolvable:$true] %s19_s19 }
   0x4   :  { %s253_s20 = smov 128   ;;  %s254_s21 = smov 8  }
   0x5   :  { %44 = dma.hbm_to_vmem [thread:$0]  %s37_s14, 384, %s39_s16, [#allocation7], %s253_s20, %s253_s20, %s254_s21  }
   0x6   :  { %s255_s22 = smov [#allocation3]   ;;  %s53_s26 = sshll.u32 %s292_s2, 4  ;;  %s54_s26 = int_to_ptr.hbm [resolvable:$true] %s53_s26 }
   0x7   :  { %s21_s23 = sshll.u32 %s255_s22, 4  ;;  %s256_s1 = smov [#allocation8]   ;;  %s22_s23 = int_to_ptr.vmem [resolvable:$true] %s21_s23 }
   0x8   :  { %27 = dma.hbm_to_vmem [thread:$0]  %s20_s19, 384, %s22_s23, [#allocation4], %s253_s20, %s253_s20, %s254_s21  }
   0x9   :  { %s55_s27 = sshll.u32 %s256_s1, 4  ;;  %s56_s27 = int_to_ptr.vmem [resolvable:$true] %s55_s27 }
   0xa   :  { %61 = dma.hbm_to_vmem [thread:$0]  %s54_s26, 384, %s56_s27, [#allocation7], %s253_s20, %s253_s20, %s254_s21  }
   0xb   :  { %246 = dma.done.wait [#allocation4], 384  }
   0xc   :  { %247 = vsyncadd [#allocation4], 4294966912 }
   0xd   :  { %248 = dma.done.wait [#allocation7], 768  }
   0xe   :  { %249 = vsyncadd [#allocation7], 4294966528  ;;  %v85_v0 = vld [vmem:[#allocation8] sm:$0xff]  ;;  %v86_v1 = vld [vmem:[#allocation8 + $0x8] sm:$0xff]  ;;  %s257_s0 = smov [#allocation9]   ;;  %s133_s30 = sshll.u32 %s293_s3, 4  ;;  %s134_s30 = int_to_ptr.hbm [resolvable:$true] %s133_s30 }
   0xf   :  { %v87_v2 = vld [vmem:[#allocation8 + $0x10] sm:$0xff]  ;;  %v89_v4 = vld [vmem:[#allocation3 + $0x8] sm:$0xff]  ;;  %v90_v5 = vld [vmem:[#allocation3 + $0x10] sm:$0xff]  ;;  %s131_s2 = sshll.u32 %s257_s0, 4  ;;  %s132_s2 = int_to_ptr.vmem [resolvable:$true] %s131_s2 }
  0x10   :  { %v88_v3 = vld [vmem:[#allocation3] sm:$0xff]  ;;  %v92_v7 = vsub.f32 %v89_v4, %v86_v1  ;;  %v93_v8 = vsub.f32 %v90_v5, %v87_v2  ;;  %v97_v9 = vld [vmem:[#allocation6] sm:$0xff]  ;;  %v99_v11 = vld [vmem:[#allocation6 + $0x10] sm:$0xff] }
  0x11   :  { %v91_v6 = vsub.f32 %v88_v3, %v85_v0  ;;  %v98_v10 = vld [vmem:[#allocation6 + $0x8] sm:$0xff]  ;;  %v100_v12 = vsub.f32 %v97_v9, %v85_v0  ;;  %v102_v14 = vsub.f32 %v99_v11, %v87_v2 }
  0x12   :  { %v101_v13 = vsub.f32 %v98_v10, %v86_v1  ;;  %v95_v16 = vmul.f32 %v92_v7, %v92_v7  ;;  %v96_v17 = vmul.f32 %v93_v8, %v93_v8 }
  0x13   :  { %v94_v15 = vmul.f32 %v91_v6, %v91_v6  ;;  %v103_v18 = vmul.f32 %v100_v12, %v100_v12  ;;  %v105_v20 = vmul.f32 %v102_v14, %v102_v14 }
  0x14   :  { %v104_v19 = vmul.f32 %v101_v13, %v101_v13 }
  0x15   :  { %v106_v21 = vadd.f32 %v103_v18, %v94_v15  ;;  %v108_v23 = vadd.f32 %v105_v20, %v96_v17 }
  0x16   :  { %v107_v22 = vadd.f32 %v104_v19, %v95_v16 }
  0x18   :  { %v110_v24 = vadd.f32 %v107_v22, %v106_v21 }
  0x1a   :  { %v111_v25 = vadd.f32 %v110_v24, %v108_v23 }
  0x1c   :  { %v118_v26 = vrot.slane %v111_v25, 4 }
  0x1e   :  { %v119_v27 = vadd.f32 %v118_v26, %v111_v25 }
  0x20   :  { %v120_v28 = vrot.slane %v119_v27, 2 }
  0x22   :  { %v121_v29 = vadd.f32 %v120_v28, %v119_v27 }
  0x24   :  { %v122_v30 = vrot.slane %v121_v29, 1 }
  0x26   :  { %v123_v31 = vadd.f32 %v122_v30, %v121_v29 }
  0x28   :  { %v124_v32 = vmul.f32 0.00032552084, %v123_v31 }
  0x2a   :  { %125 = vst [vmem:[#allocation9] sm:$0x1] %v124_v32 }
  0x2b   :  { %136 = dma.vmem_to_hbm [thread:$0]  %s132_s2, 16, %s134_s30, [#allocation5]  }
  0x2c   :  { %250 = dma.done.wait [#allocation5], 16  }
  0x2d   :  { %251 = vsyncadd [#allocation5], 4294967280 }
  0x2e   :  { %141 = vsyncpa [#allocation4], 1 }
  0x2f   :  { %142 = vsyncpa [#allocation7], 1 }
  0x30   :  { %143 = vsyncpa [#allocation5], 1 }

</bundles_post_ra>
